<compile_context>
chip_gen: v6e
topology: v6e:2x2x1
jax: 0.10.0
libtpu: 0.0.40
codegen_flags: <defaults>
</compile_context>

<pallas_src>
import jax
import jax.numpy as jnp
from jax.experimental import pallas as pl
from jax.experimental.pallas import tpu as pltpu


def _round_up(x, m):
    return ((x + m - 1) // m) * m


def _sublane_multiple(dtype):
    itemsize = jnp.dtype(dtype).itemsize
    return max(8, 32 // itemsize)          # f32 -> 8, bf16 -> 16, int8 -> 32


def _padded_plane_bytes(h, w, dtype):
    """VMEM bytes of an (h, w) plane after (sublane, 128-lane) tiling."""
    itemsize = jnp.dtype(dtype).itemsize
    sub = _sublane_multiple(dtype)
    return _round_up(max(h, 1), sub) * _round_up(max(w, 1), 128) * itemsize


def _vmem_budget_bytes():
    """Budget for the pipelined (double-buffered) in+out tiles of one step."""
    try:
        cap = pltpu.get_tpu_info().vmem_capacity_bytes
    except Exception:
        cap = 64 << 20                      # conservative (v7x physical VMEM)
    # Block-coarsening gains plateau around 0.5-2 MiB of useful bytes per tile,
    # so stay far below scoped-VMEM defaults (16 MiB v5e / 32 MiB v6e, v7x).
    return min(cap // 4, 8 << 20)


def _pick_row_tile(R, H, W, Hout, Wout, dtype, budget):
    """Largest row tile whose double-buffered in+out tiles fit the budget.

    Returns 0 if even a single (Hout, Wout) plane does not fit.
    """
    in_b = _padded_plane_bytes(H, W, dtype)
    out_b = _padded_plane_bytes(Hout, Wout, dtype)
    per_row = 2 * (in_b + out_b)            # x2: double-buffered pipeline
    tr_fit = budget // per_row
    if tr_fit == 0:
        return 0
    tr_cap = min(R, tr_fit)
    if R >= 2:
        # Keep >= 2 grid steps on the parallel axis (v7x has 2 TensorCores).
        tr_cap = min(tr_cap, (R + 1) // 2)
    tr_cap = max(tr_cap, 1)
    # Prefer a divisor of R (no ragged last block) unless it costs > 2x steps.
    best_div = max(d for d in range(1, tr_cap + 1) if R % d == 0)
    return best_div if best_div * 2 >= tr_cap else tr_cap


def _pick_h_tile(H, W, Hout, Wout, dtype, budget):
    """Row-chunk size (multiple of the sublane tile) for the H-tiled path."""
    sub = _sublane_multiple(dtype)
    th = sub
    while True:
        nxt = th + sub
        if nxt > _round_up(Hout, sub):
            break
        per_step = 2 * (_padded_plane_bytes(nxt, W, dtype)
                        + _padded_plane_bytes(nxt, Wout, dtype))
        if per_step > budget:
            break
        th = nxt
    return th


def _make_plane_kernel(pad, H, W, Hout, Wout):
    pad_l, pad_r, pad_t, pad_b = pad

    def kernel(x_ref, o_ref):
        # x_ref block: (TR, H, W); o_ref block: (TR, Hout, Wout).
        tr = o_ref.shape[0]
        dt = o_ref.dtype
        # Interior: store the input directly at its padded offset.  No
        # zeros+concatenate relayout copy; interior bytes written exactly once.
        o_ref[:, pad_t:pad_t + H, pad_l:pad_l + W] = x_ref[...]
        # Zero only the thin pad strips (corner double-writes are negligible).
        if pad_t:
            o_ref[:, :pad_t, :] = jnp.zeros((tr, pad_t, Wout), dt)
        if pad_b:
            o_ref[:, pad_t + H:, :] = jnp.zeros((tr, pad_b, Wout), dt)
        if pad_l:
            o_ref[:, :, :pad_l] = jnp.zeros((tr, Hout, pad_l), dt)
        if pad_r:
            o_ref[:, :, pad_l + W:] = jnp.zeros((tr, Hout, pad_r), dt)

    return kernel


def _make_htile_kernel(pad, H, W, th):
    pad_l, pad_r, pad_t, pad_b = pad
    assert pad_t == 0

    def kernel(x_ref, o_ref):
        # x_ref block: (1, TH, W) over input rows [hb*TH, hb*TH+TH)
        # (stale/garbage past H); o_ref block: (1, TH, Wout) over output rows
        # [hb*TH, hb*TH+TH) (out-of-range rows are masked on writeback).
        hb = pl.program_id(1)
        dt = o_ref.dtype
        x = x_ref[...]
        # Rows whose global index is >= H are bottom padding -> zero them.
        row = hb * th + jax.lax.broadcasted_iota(jnp.int32, x.shape, 1)
        x = jnp.where(row < H, x, jnp.zeros_like(x))
        o_ref[:, :, pad_l:pad_l + W] = x
        if pad_l:
            o_ref[:, :, :pad_l] = jnp.zeros(x.shape[:2] + (pad_l,), dt)
        if pad_r:
            o_ref[:, :, pad_l + W:] = jnp.zeros(x.shape[:2] + (pad_r,), dt)

    return kernel


def custom_padding(x, pad=(0, 1, 0, 1), *, vmem_budget_bytes=None):
    """Equivalent of torch.nn.functional.F.pad(x, pad) for 4-D NCHW input."""
    pad_l, pad_r, pad_t, pad_b = pad
    if min(pad) < 0:
        raise ValueError("negative (cropping) pads are not supported")
    B, C, H, W = x.shape
    Hout = H + pad_t + pad_b
    Wout = W + pad_l + pad_r
    R = B * C

    budget = (_vmem_budget_bytes() if vmem_budget_bytes is None
              else vmem_budget_bytes)

    # Fold batch into the channel axis (free row-major reshapes) so tiling is
    # over B*C rows, not just C.
    x2 = x.reshape(R, H, W)

    tr = _pick_row_tile(R, H, W, Hout, Wout, x.dtype, budget)
    use_plane_path = tr >= 1
    if tr == 0 and pad_t > 0:
        # TODO(synk): top-pad-aware H-tiling not implemented; fall back to one
        # full plane per step and rely on the raised scoped-VMEM limit.
        tr = 1
        use_plane_path = True

    cparams = pltpu.CompilerParams(
        dimension_semantics=("parallel",) if use_plane_path
        else ("parallel", "parallel"),
        vmem_limit_bytes=32 * 1024 * 1024,
    )

    if use_plane_path:
        kernel = _make_plane_kernel(pad, H, W, Hout, Wout)
        out2 = pl.pallas_call(
            kernel,
            out_shape=jax.ShapeDtypeStruct((R, Hout, Wout), x.dtype),
            grid_spec=pltpu.PrefetchScalarGridSpec(
                num_scalar_prefetch=0,
                grid=(pl.cdiv(R, tr),),
                in_specs=[pl.BlockSpec((tr, H, W), lambda rb: (rb, 0, 0))],
                out_specs=pl.BlockSpec((tr, Hout, Wout),
                                       lambda rb: (rb, 0, 0)),
            ),
            compiler_params=cparams,
        )(x2)
    else:
        # Single plane exceeds the VMEM budget: tile the row (H) axis.
        th = _pick_h_tile(H, W, Hout, Wout, x.dtype, budget)
        max_in_hb = max(pl.cdiv(H, th) - 1, 0)   # clamp fully-OOB input blocks
        kernel = _make_htile_kernel(pad, H, W, th)
        out2 = pl.pallas_call(
            kernel,
            out_shape=jax.ShapeDtypeStruct((R, Hout, Wout), x.dtype),
            grid_spec=pltpu.PrefetchScalarGridSpec(
                num_scalar_prefetch=0,
                grid=(R, pl.cdiv(Hout, th)),
                in_specs=[pl.BlockSpec(
                    (1, th, W),
                    lambda rb, hb: (rb, jnp.minimum(hb, max_in_hb), 0))],
                out_specs=pl.BlockSpec((1, th, Wout),
                                       lambda rb, hb: (rb, hb, 0)),
            ),
            compiler_params=cparams,
        )(x2)

    return out2.reshape(B, C, Hout, Wout)


if __name__ == "__main__":
    key = jax.random.PRNGKey(0)
    B, C, H, W = 2, 4, 16, 16
    x = jax.random.normal(key, (B, C, H, W), dtype=jnp.float32)

    out = custom_padding(x, pad=(0, 1, 0, 1))
    out = jax.block_until_ready(out)
    ref = jnp.pad(x, ((0, 0), (0, 0), (0, 1), (0, 1)))
    assert out.shape == (B, C, H + 1, W + 1), out.shape
    assert jnp.array_equal(out, ref), "mismatch vs reference (plane path)"

    # Exercise the H-tiled fallback (tiny budget forces it).
    x3 = jax.random.normal(jax.random.PRNGKey(1), (1, 3, 40, 24), jnp.float32)
    out3 = jax.block_until_ready(
        custom_padding(x3, pad=(0, 1, 0, 1), vmem_budget_bytes=64 * 1024))
    assert jnp.array_equal(
        out3, jnp.pad(x3, ((0, 0), (0, 0), (0, 1), (0, 1)))), "H-tiled path"

    # Exercise a ragged (non-divisor) last row block on the plane path.
    x4 = jax.random.normal(jax.random.PRNGKey(2), (1, 5, 8, 8), jnp.float32)
    out4 = jax.block_until_ready(custom_padding(x4))
    assert jnp.array_equal(
        out4, jnp.pad(x4, ((0, 0), (0, 0), (0, 1), (0, 1)))), "ragged path"

    print("KERNEL_OK")
</pallas_src>

<mosaic_0001>
module attributes {stable_mosaic.version = 11 : i64} {
  func.func @kernel(%arg0: i32, %arg1: memref<4x16x16xf32, #tpu.memory_space<vmem>>, %arg2: memref<4x17x17xf32, #tpu.memory_space<vmem>>) attributes {dimension_semantics = [#tpu.dimension_semantics<parallel>], iteration_bounds = array<i64: 2>, scalar_prefetch = 0 : i64, scratch_operands = 0 : i64, tpu.core_type = #tpu.core_type<tc>, window_params = [{transform_indices = @transform_0, window_bounds = array<i64: 4, 16, 16>}, {transform_indices = @transform_1, window_bounds = array<i64: 4, 17, 17>}]} {
    %c0 = arith.constant 0 : index
    %c0_0 = arith.constant 0 : index
    %c0_1 = arith.constant 0 : index
    %0 = vector.load %arg1[%c0, %c0_0, %c0_1] : memref<4x16x16xf32, #tpu.memory_space<vmem>>, vector<4x16x16xf32>
    %c0_2 = arith.constant 0 : index
    %c0_3 = arith.constant 0 : index
    %c0_4 = arith.constant 0 : index
    %1 = vector.load %arg2[%c0_2, %c0_3, %c0_4] : memref<4x17x17xf32, #tpu.memory_space<vmem>>, vector<4x16x16xf32>
    tpu.vector_store %arg2[%c0_2, %c0_3, %c0_4], %0 {strides = array<i32>} : memref<4x17x17xf32, #tpu.memory_space<vmem>>, vector<4x16x16xf32>,
    %cst = arith.constant 0.000000e+00 : f32
    %2 = vector.broadcast %cst : f32 to vector<4x1x17xf32>
    %c0_5 = arith.constant 0 : index
    %c16 = arith.constant 16 : index
    %c0_6 = arith.constant 0 : index
    %3 = vector.load %arg2[%c0_5, %c16, %c0_6] : memref<4x17x17xf32, #tpu.memory_space<vmem>>, vector<4x1x17xf32>
    tpu.vector_store %arg2[%c0_5, %c16, %c0_6], %2 {strides = array<i32>} : memref<4x17x17xf32, #tpu.memory_space<vmem>>, vector<4x1x17xf32>,
    %cst_7 = arith.constant 0.000000e+00 : f32
    %4 = vector.broadcast %cst_7 : f32 to vector<4x17x1xf32>
    %c0_8 = arith.constant 0 : index
    %c0_9 = arith.constant 0 : index
    %c16_10 = arith.constant 16 : index
    %5 = vector.load %arg2[%c0_8, %c0_9, %c16_10] : memref<4x17x17xf32, #tpu.memory_space<vmem>>, vector<4x17x1xf32>
    tpu.vector_store %arg2[%c0_8, %c0_9, %c16_10], %4 {strides = array<i32>} : memref<4x17x17xf32, #tpu.memory_space<vmem>>, vector<4x17x1xf32>,
    return
  }
  func.func @transform_0(%arg0: i32) -> (i32, i32, i32) {
    %c0_i32 = arith.constant 0 : i32
    %c0_i32_0 = arith.constant 0 : i32
    %c0_i32_1 = arith.constant 0 : i32
    return %arg0, %c0_i32, %c0_i32_0 : i32, i32, i32
  }
  func.func @transform_1(%arg0: i32) -> (i32, i32, i32) {
    %c0_i32 = arith.constant 0 : i32
    %c0_i32_0 = arith.constant 0 : i32
    %c0_i32_1 = arith.constant 0 : i32
    return %arg0, %c0_i32, %c0_i32_0 : i32, i32, i32
  }
}

</mosaic_0001>

<bundles_post_ra>
// kernel: tpu_custom_call.1
= control target key start
LH: loop header
LB: loop body
LE: loop exit
PB: predicated region body
PF: predicated region fallthrough
CT: control target
= control target key end

     0   :  { %6 = vsyncpa [#allocation3], 0  ;;  %s534_s0 = inlined_call_operand.hbm [shape: f32[8,16,16], index: 0, kind: input, shape index: {}]   ;;  %s535_s1 = inlined_call_operand.vmem [shape: f32[8,17,17], index: 1, kind: output, shape index: {}]  }
   0x1   :  { %8 = vsyncpa [#allocation3 + $0x1], 0  ;;  %s384_s6 = smov 0   ;;  %s386_s7 = smov 0  }
   0x2   :  { %s388_s8 = smov 0   ;;  %s390_s9 = smov 0  }
   0x3 LB: > { %s247_s10 = sadd.s32 4294967295, %s368_s9   ;;  %s404_s11 = sadd.s32 1, %s368_s9   ;;  %s368_s9 = sphi %s390_s9, %s544_s9   ;;  %s364_s8 = sphi %s388_s8, %s543_s8   ;;  %s360_s7 = sphi %s386_s7, %s542_s7   ;;  %s356_s6 = sphi %s384_s6, %s541_s6  }
   0x4   : > { %s18_s12 = ssub.s32 %s368_s9, %s404_s11  ;;  %s21_s13 = sadd.s32 1, %s364_s8 }
   0x5   : > { %p19_p0 = scmp.eq.s32.totalorder %s18_s12, 0  ;;  %p28_p1 = scmp.ne.s32.totalorder %s364_s8, %s360_s7 }
   0x6   : > { %p29_p2 = scmp.eq.s32.totalorder %s368_s9, 0  ;;  %p34_p3 = scmp.ne.s32.totalorder %s360_s7, %s356_s6 }
   0x7   : > { %s414_s14 = scalar_select %p19_p0, %s364_s8, %s21_s13  }
   0x8   : > { %p30_p4 = por %p29_p2, %p28_p1  ;;  %p35_p5 = scmp.eq.s32.totalorder %s247_s10, 0 }
   0x9   : > { %p270_p6 = scmp.lt.s32.totalorder %s368_s9, 2  ;;  %s84_s16 = sand.u32 1, %s364_s8  }
   0xa   : > { %p419_p7 = por %p35_p5, %p34_p3  ;;  %s251_s17 = sshll.u32 %s84_s16, 6 }
   0xb   : > { %s262_s18 = sshll.u32 %s368_s9, 10  ;;  %s88_s22 = scalar_lea.vmem [#allocation2], %s251_s17 }
   0xc   : > { %s537_s15 = scalar_select %p419_p7, 1, 0 }
   0xd   : > { %s428_s21 = scalar_lea.hbm %s534_s0, %s262_s18  ;;  %s96_s23 = sshll.u32 %s88_s22, 4  ;;  %s430_s23 = int_to_ptr.vmem [resolvable:$true] %s96_s23 }
   0xe   : > { %p432_p8 = pnand %p270_p6, %p30_p4  ;;  %s437_s25 = scalar_lea.sflag [#allocation3], %s84_s16 }
   0xf   : > { %s306_s26 = scalar_lea.hbm %s428_s21, 1024  ;;  %s311_s29 = scalar_lea.hbm %s534_s0, 2048 }
  0x10   : > { %p307_p10 = scmp.ne.s32.totalorder %s428_s21, %s306_s26  ;;  %p308_p11 = pneg %p432_p8 }
  0x11   : > { %p312_p0 = scmp.lt.s32.totalorder %s428_s21, %s534_s0  ;;  %p313_p1 = scmp.lt.s32.totalorder %s311_s29, %s306_s26 }
  0x12   : > { %p309_p12 = pnand %p308_p11, %p307_p10 }
  0x13   : > { %p314_p2 = por %p313_p1, %p312_p0 }
  0x14   : > { %p310_p13 = pneg %p309_p12 }
  0x16   : > { %p315_p3 = pnand %p314_p2, %p310_p13 }
  0x18   : > { %318 = shalt.err (!%p315_p3)
}
  0x19   : > { %s319_s3 = scalar_lea.vmem %s430_s23, 1024  ;;  %s370_s4 = smov [#allocation2]  }
  0x1a   : > { %p320_p4 = scmp.ne.s32.totalorder %s430_s23, %s319_s3  ;;  %s324_s5 = sshll.u32 %s370_s4, 4  ;;  %s325_s5 = int_to_ptr.vmem [resolvable:$false] %s324_s5 }
  0x1b   : > { %s326_s6 = scalar_lea.vmem %s325_s5, 2048  ;;  %p327_p10 = scmp.lt.s32.totalorder %s430_s23, %s325_s5 }
  0x1c   : > { %p322_p5 = pnand %p320_p4, %p308_p11  ;;  %p328_p12 = scmp.lt.s32.totalorder %s326_s6, %s319_s3 }
  0x1e   : > { %p323_p6 = pneg %p322_p5  ;;  %p329_p9 = por %p328_p12, %p327_p10 }
  0x20   : > { %p330_p7 = pnand %p329_p9, %p323_p6 }
  0x22   : > { %333 = shalt.err (!%p330_p7)
}
  0x23   : > { %s371_s12 = smov 128   ;;  %s372_s13 = smov 8  }
  0x24   : > { %269 = dma.hbm_to_vmem [thread:$0]  (!%p432_p8), %s428_s21, 1024, %s430_s23, %s437_s25, %s371_s12, %s371_s12, %s372_s13  }
  0x25   : > { %p104_p11 = scmp.lt.s32.totalorder %s368_s9, 3  ;;  %p539_p13 = scmp.ge.s32.totalorder %s368_s9, 1 }
  0x27   : > { %p105_p0 = pnand %p539_p13, %p104_p11 }
  0x28   : > { %s110_s16 = sand.u32 (!%p105_p0), 1, %s360_s7   ;;  %p540_p7 = scmp.ne.s32.totalorder (!%p105_p0), %s537_s15, 0 }
  0x29   : > { %108 = sbr.rel (%p105_p0) target bundleno = 66 (0x42), region = 24  ;;  %s256_s17 = sshll.u32 (!%p105_p0), %s110_s16, 6 }
  0x2a   : > { %s111_s18 = scalar_lea.sflag (!%p105_p0), [#allocation3], %s110_s16  ;;  %s114_s19 = scalar_lea.vmem (!%p105_p0), [#allocation2], %s256_s17 }
  0x2e   : > { %351 = dma.done.wait (%p540_p7), %s111_s18, 1024  }
  0x2f   : > { %353 = vsyncadd (%p540_p7), %s111_s18, 4294966272  ;;  %s257_s20 = sshll.u32 %s247_s10, 2  ;;  %vm150_vm0 = vcmask 130048   ;;  %vm159_vm1 = vcmask 131072   ;;  %v142_v0 = vld [vmem:[%s114_s19] sm:$0xff]  ;;  %v143_v1 = vld [vmem:[%s114_s19 + $0x8] sm:$0xff] }
  0x30   : > { %p136_p9 = scmp.lt.s32.totalorder %s257_s20, 7  ;;  %v144_v2 = vld [vmem:[%s114_s19 + $0x10] sm:$0xff]  ;;  %v373_v3 = vmov 0.0   ;;  %v145_v4 = vld [vmem:[%s114_s19 + $0x18] sm:$0xff]  ;;  %v146_v5 = vld [vmem:[%s114_s19 + $0x20] sm:$0xff]  ;;  %vm164_vm2 = vcmask 138368  }
  0x31   : > { %v147_v6 = vld [vmem:[%s114_s19 + $0x28] sm:$0xff]  ;;  %v148_v7 = vld [vmem:[%s114_s19 + $0x30] sm:$0xff]  ;;  %v149_v8 = vld [vmem:[%s114_s19 + $0x38] sm:$0xff]  ;;  %vm167_vm3 = vcmask 131200  }
  0x32   : > { %s546_s20 = smov (!%p136_p9, %s257_s20), 7 }
  0x33   : > { %s263_s21 = smul.u32 24, %s546_s20 }
  0x35   : > { %s471_s24 = scalar_lea.vmem %s535_s1, %s263_s21 }
  0x36   : > { %151 = vst.msk [vmem:[%s471_s24] sm:$0xff] %vm150_vm0, %v142_v0  ;;  %152 = vst.msk [vmem:[%s471_s24 + $0x8] sm:$0xff] %vm150_vm0, %v143_v1 }
  0x37   : > { %160 = vst.msk [vmem:[%s471_s24 + $0x10] sm:$0x1] %vm159_vm1, %v373_v3  ;;  %161 = vst.msk [vmem:[%s471_s24 + $0x28] sm:$0x1] %vm159_vm1, %v373_v3 }
  0x38   : > { %153 = vst.msk [vmem:[%s471_s24 + $0x18] sm:$0xff] %vm150_vm0, %v144_v2  ;;  %154 = vst.msk [vmem:[%s471_s24 + $0x20] sm:$0xff] %vm150_vm0, %v145_v4 }
  0x39   : > { %162 = vst.msk [vmem:[%s471_s24 + $0x40] sm:$0x1] %vm159_vm1, %v373_v3  ;;  %163 = vst.msk [vmem:[%s471_s24 + $0x58] sm:$0x1] %vm159_vm1, %v373_v3 }
  0x3a   : > { %155 = vst.msk [vmem:[%s471_s24 + $0x30] sm:$0xff] %vm150_vm0, %v146_v5  ;;  %156 = vst.msk [vmem:[%s471_s24 + $0x38] sm:$0xff] %vm150_vm0, %v147_v6 }
  0x3b   : > { %157 = vst.msk [vmem:[%s471_s24 + $0x48] sm:$0xff] %vm150_vm0, %v148_v7  ;;  %158 = vst.msk [vmem:[%s471_s24 + $0x50] sm:$0xff] %vm150_vm0, %v149_v8 }
  0x3c   : > { %165 = vst.msk [vmem:[%s471_s24] sm:$0xff] %vm164_vm2, %v373_v3  ;;  %166 = vst.msk [vmem:[%s471_s24 + $0x8] sm:$0xff] %vm164_vm2, %v373_v3 }
  0x3d   : > { %168 = vst.msk [vmem:[%s471_s24 + $0x10] sm:$0x1] %vm167_vm3, %v373_v3  ;;  %171 = vst.msk [vmem:[%s471_s24 + $0x28] sm:$0x1] %vm167_vm3, %v373_v3 }
  0x3e   : > { %169 = vst.msk [vmem:[%s471_s24 + $0x18] sm:$0xff] %vm164_vm2, %v373_v3  ;;  %170 = vst.msk [vmem:[%s471_s24 + $0x20] sm:$0xff] %vm164_vm2, %v373_v3 }
  0x3f   : > { %172 = vst.msk [vmem:[%s471_s24 + $0x30] sm:$0xff] %vm164_vm2, %v373_v3  ;;  %173 = vst.msk [vmem:[%s471_s24 + $0x38] sm:$0xff] %vm164_vm2, %v373_v3 }
  0x40   : > { %174 = vst.msk [vmem:[%s471_s24 + $0x40] sm:$0x1] %vm167_vm3, %v373_v3  ;;  %177 = vst.msk [vmem:[%s471_s24 + $0x58] sm:$0x1] %vm167_vm3, %v373_v3 }
  0x41   : > { %175 = vst.msk [vmem:[%s471_s24 + $0x48] sm:$0xff] %vm164_vm2, %v373_v3  ;;  %176 = vst.msk [vmem:[%s471_s24 + $0x50] sm:$0xff] %vm164_vm2, %v373_v3 }
  0x42 PF: > { %p11_p8 = scmp.ge.s32.totalorder %s404_s11, 4   ;;  %s541_s6 = smov %s360_s7 }
  0x43   : > { %s542_s7 = smov %s364_s8  ;;  %s543_s8 = smov %s414_s14 }
  0x44   : > { %s544_s9 = smov %s404_s11  ;;  %13 = sbr.rel (!%p11_p8) target bundleno = 3 (0x3), region = 64 }
  0x49   :  { %202 = vsyncpa [#allocation3], 1 }
  0x4a   :  { %204 = vsyncpa [#allocation3 + $0x1], 1 }

</bundles_post_ra>
